<compile_context>
chip_gen: v7x
topology: tpu7x:2x2x1
jax: 0.10.0
libtpu: 0.0.40
codegen_flags: <defaults>
</compile_context>

<pallas_src>
import jax
import jax.numpy as jnp
from jax import lax
from jax.experimental import pallas as pl
from jax.experimental.pallas import tpu as pltpu


_FAST_PATH_ELEMS = 1 << 20            # below this, fused XLA reduce wins
_BLOCK_BYTES = 8 * 1024 * 1024        # HBM bytes per input per grid block
_SUB_ELEMS = 8 * 1024                 # elements per inner sub-step (~8 vregs f32)
_UNROLL = 4                           # sub-steps unrolled per fori_loop iteration
_ACC_ROWS = 8                         # f32 accumulator sublane rows
_LANE_CHOICES = (1024, 512, 256, 128)
_VMEM_LIMIT_BYTES = 48 * 1024 * 1024

_PARALLEL = getattr(pltpu, "PARALLEL", "parallel")
_ARBITRARY = getattr(pltpu, "ARBITRARY", "arbitrary")


def _core_split():
    """Best-effort: (#TensorCores one Pallas kernel spans, core-axis semantics)."""
    try:
        kind = jax.devices()[0].device_kind.lower().replace(" ", "")
    except Exception:
        return 1, None
    if "v7" in kind or kind.startswith("tpu7"):
        # v7x: two TensorCores per chip; CORE_PARALLEL actually shards the axis.
        return 2, getattr(pltpu, "CORE_PARALLEL", _PARALLEL)
    if "v4" in kind or "v5p" in kind:
        # Megacore: "parallel" grid axes are split across the two cores.
        return 2, _PARALLEL
    # v2/v3 (per-core JAX devices), v5e, v6e: a kernel sees a single TensorCore.
    return 1, None


def _make_ssd_kernel(*, block_rows, lane_w, sub_rows, acc_rows, unroll,
                     rows_total, inner_steps, two_d_grid, need_mask):
    """Sum-of-squared-differences kernel for one fixed tiling."""
    chunk_rows = sub_rows * unroll
    n_chunks = block_rows // chunk_rows
    assert n_chunks * chunk_rows == block_rows
    assert sub_rows % acc_rows == 0

    def kernel(x_ref, t_ref, partial_ref):
        if two_d_grid:
            i = pl.program_id(1)                                  # reduction axis
            logical_block = pl.program_id(0) * inner_steps + i
        else:
            i = pl.program_id(0)
            logical_block = i

        @pl.when(i == 0)
        def _():
            partial_ref[...] = jnp.zeros_like(partial_ref)

        block_row0 = logical_block * block_rows                   # scalar (sreg)

        def accumulate(masked):
            iota = (lax.broadcasted_iota(jnp.int32, (sub_rows, lane_w), 0)
                    if masked else None)

            def chunk_body(j, acc):
                chunk_row0 = j * chunk_rows
                for u in range(unroll):                           # static unroll
                    off = pl.multiple_of(chunk_row0 + u * sub_rows, sub_rows)
                    x = x_ref[pl.ds(off, sub_rows), :]
                    t = t_ref[pl.ds(off, sub_rows), :]
                    if x.dtype != jnp.float32:
                        x = x.astype(jnp.float32)
                    if t.dtype != jnp.float32:
                        t = t.astype(jnp.float32)
                    d = x - t
                    if masked:
                        keep = (block_row0 + off + iota) < rows_total
                        d = jnp.where(keep, d, 0.0)
                    d2 = d * d
                    for r in range(sub_rows // acc_rows):         # fold to acc_rows
                        acc = acc + d2[r * acc_rows:(r + 1) * acc_rows, :]
                return acc

            acc = lax.fori_loop(0, n_chunks, chunk_body,
                                jnp.zeros((acc_rows, lane_w), jnp.float32))
            partial_ref[...] += acc[None, :, :]

        if not need_mask:
            accumulate(False)
        else:
            # Mask only on blocks that actually overhang the data (partial last
            # block, or the clamped duplicate block of the core split).
            is_edge = (block_row0 + block_rows) > rows_total

            @pl.when(jnp.logical_not(is_edge))
            def _():
                accumulate(False)

            @pl.when(is_edge)
            def _():
                accumulate(True)

    return kernel


def content_loss(input_x, target):
    """ContentLoss.forward: returns (input, loss) with loss = sum((input-target)**2)/2."""
    assert input_x.shape == target.shape, (input_x.shape, target.shape)
    n = input_x.size
    if n == 0:
        return input_x, jnp.zeros((), jnp.float32)

    xf = input_x.reshape(-1)
    tf = target.reshape(-1)

    # Small inputs: a single fused XLA reduce is already near the HBM roofline
    # and avoids pallas_call launch / grid overhead.
    if n < _FAST_PATH_ELEMS:
        d = xf.astype(jnp.float32) - tf.astype(jnp.float32)
        return input_x, 0.5 * jnp.sum(d * d)

    # Tail that is not a multiple of 128 lanes is summed in plain JAX (<128
    # elements); the aligned prefix goes through the kernel.  No jnp.pad copy.
    n_main = (n // 128) * 128
    tail_sq = jnp.zeros((), jnp.float32)
    if n_main != n:
        # TODO(synk): an in-kernel masked 1-D tail would also avoid the prefix
        # slice XLA may materialise here; only hit when numel % 128 != 0.
        dt = xf[n_main:].astype(jnp.float32) - tf[n_main:].astype(jnp.float32)
        tail_sq = jnp.sum(dt * dt)
        xf = xf[:n_main]
        tf = tf[:n_main]

    lane_w = next(w for w in _LANE_CHOICES if n_main % w == 0)    # 128 always works
    rows = n_main // lane_w
    x2d = xf.reshape(rows, lane_w)
    t2d = tf.reshape(rows, lane_w)

    item_x = jnp.dtype(input_x.dtype).itemsize
    item_t = jnp.dtype(target.dtype).itemsize
    packing = max(1, 4 // min(item_x, item_t))      # sublane packing of narrow dtypes
    sub_rows = max(_SUB_ELEMS // lane_w, 8 * packing)
    chunk_rows = sub_rows * _UNROLL

    if rows < chunk_rows:   # degenerate (cannot happen past the fast-path gate)
        d = x2d.astype(jnp.float32) - t2d.astype(jnp.float32)
        return input_x, 0.5 * (jnp.sum(d * d) + tail_sq)

    # Byte-sized blocks (~8 MiB per input per grid step), multiple of chunk_rows.
    desired_rows = ((_BLOCK_BYTES // max(item_x, item_t)) // lane_w
                    // chunk_rows) * chunk_rows
    rows_floor = (rows // chunk_rows) * chunk_rows
    block_rows = max(chunk_rows, min(desired_rows, rows_floor))
    num_blocks = -(-rows // block_rows)

    num_cores, core_sem = _core_split()
    if num_blocks < 2:
        num_cores = 1

    if num_cores > 1:
        inner = -(-num_blocks // num_cores)
        grid = (num_cores, inner)
        in_index = lambda c, i: (jnp.minimum(c * inner + i, num_blocks - 1), 0)
        out_index = lambda c, i: (c, 0, 0)
        dim_sem = (core_sem, _ARBITRARY)
        covered_rows = num_cores * inner * block_rows
        two_d_grid = True
    else:
        inner = num_blocks
        grid = (num_blocks,)
        in_index = lambda i: (i, 0)
        out_index = lambda i: (0, 0, 0)
        dim_sem = (_ARBITRARY,)
        covered_rows = num_blocks * block_rows
        two_d_grid = False

    need_mask = covered_rows != rows

    kernel = _make_ssd_kernel(
        block_rows=block_rows, lane_w=lane_w, sub_rows=sub_rows,
        acc_rows=_ACC_ROWS, unroll=_UNROLL, rows_total=rows,
        inner_steps=inner, two_d_grid=two_d_grid, need_mask=need_mask)

    params_cls = getattr(pltpu, "CompilerParams", None)
    if params_cls is None:
        params_cls = getattr(pltpu, "TPUCompilerParams")
    compiler_params = params_cls(dimension_semantics=dim_sem,
                                 vmem_limit_bytes=_VMEM_LIMIT_BYTES)

    partials = pl.pallas_call(
        kernel,
        out_shape=jax.ShapeDtypeStruct((num_cores, _ACC_ROWS, lane_w),
                                       jnp.float32),
        grid=grid,
        in_specs=[pl.BlockSpec((block_rows, lane_w), in_index),
                  pl.BlockSpec((block_rows, lane_w), in_index)],
        out_specs=pl.BlockSpec((1, _ACC_ROWS, lane_w), out_index),
        compiler_params=compiler_params,
    )(x2d, t2d)

    loss = 0.5 * (jnp.sum(partials) + tail_sq)

    # Forward pass-through (ContentLoss.forward returns its input unchanged).
    return input_x, loss


if __name__ == "__main__":
    key = jax.random.PRNGKey(0)
    k1, k2, k3, k4, k5, k6 = jax.random.split(key, 6)

    def ref_loss(a, b):
        return jnp.sum((a.astype(jnp.float32) - b.astype(jnp.float32)) ** 2) / 2.0

    # (1) Tiny content-layer feature map: exercises the small-n fast path and
    #     the pass-through semantics.
    x = jax.random.normal(k1, (2, 4, 16, 16), dtype=jnp.float32)
    t = jax.random.normal(k2, (2, 4, 16, 16), dtype=jnp.float32)
    out, loss = content_loss(x, t)
    jax.block_until_ready((out, loss))
    assert jnp.allclose(loss, ref_loss(x, t), rtol=1e-5, atol=1e-5), loss
    assert jnp.array_equal(out, x)

    # (2) Realistic VGG conv feature map (1, 256, 64, 64) -> Pallas kernel path.
    xl = jax.random.normal(k3, (1, 256, 64, 64), dtype=jnp.float32)
    tl = jax.random.normal(k4, (1, 256, 64, 64), dtype=jnp.float32)
    out_l, loss_l = content_loss(xl, tl)
    jax.block_until_ready((out_l, loss_l))
    ref_l = ref_loss(xl, tl)
    assert jnp.allclose(loss_l, ref_l, rtol=1e-4, atol=1e-2), (loss_l, ref_l)
    assert out_l.shape == xl.shape

    # (3) bf16 inputs stay bf16 in HBM; upcast happens inside the kernel.
    xb = xl.astype(jnp.bfloat16)
    tb = tl.astype(jnp.bfloat16)
    _, loss_b = content_loss(xb, tb)
    loss_b = jax.block_until_ready(loss_b)
    ref_b = ref_loss(xb, tb)
    assert jnp.allclose(loss_b, ref_b, rtol=1e-3, atol=1.0), (loss_b, ref_b)

    # (4) Non-128-aligned numel (image-like 3x593x593): aligned prefix through
    #     the kernel (exercises the edge-block mask), <128-element tail in JAX.
    xu = jax.random.normal(k5, (1, 3, 593, 593), dtype=jnp.float32)
    tu = jax.random.normal(k6, (1, 3, 593, 593), dtype=jnp.float32)
    _, loss_u = content_loss(xu, tu)
    loss_u = jax.block_until_ready(loss_u)
    ref_u = ref_loss(xu, tu)
    assert jnp.allclose(loss_u, ref_u, rtol=1e-4, atol=1e-2), (loss_u, ref_u)

    print("KERNEL_OK")
</pallas_src>

<mosaic_0001>
module attributes {stable_mosaic.version = 11 : i64} {
  func.func @kernel(%arg0: i32, %arg1: memref<1024x1024xf32, #tpu.memory_space<vmem>>, %arg2: memref<1024x1024xf32, #tpu.memory_space<vmem>>, %arg3: memref<1x8x1024xf32, #tpu.memory_space<vmem>>) attributes {dimension_semantics = [#tpu.dimension_semantics<arbitrary>], iteration_bounds = array<i64: 1>, scalar_prefetch = 0 : i64, scratch_operands = 0 : i64, tpu.core_type = #tpu.core_type<tc>, window_params = [{transform_indices = @transform_0, window_bounds = array<i64: 1024, 1024>}, {transform_indices = @transform_1, window_bounds = array<i64: 1024, 1024>}, {pipeline_mode = #tpu.pipeline_mode<synchronous>, transform_indices = @transform_2, window_bounds = array<i64: 1, 8, 1024>}]} {
    %c0_i32 = arith.constant 0 : i32
    %0 = arith.cmpi eq, %arg0, %c0_i32 : i32
    %1 = arith.extui %0 : i1 to i32
    %c0_i32_0 = arith.constant 0 : i32
    %2 = arith.cmpi ne, %1, %c0_i32_0 : i32
    scf.if %2 {
      %cst_8 = arith.constant 0.000000e+00 : f32
      %10 = vector.broadcast %cst_8 : f32 to vector<1x8x1024xf32>
      %c0_9 = arith.constant 0 : index
      %c0_10 = arith.constant 0 : index
      %c0_11 = arith.constant 0 : index
      %11 = vector.load %arg3[%c0_9, %c0_10, %c0_11] : memref<1x8x1024xf32, #tpu.memory_space<vmem>>, vector<1x8x1024xf32>
      tpu.vector_store %arg3[%c0_9, %c0_10, %c0_11], %10 {strides = array<i32>} : memref<1x8x1024xf32, #tpu.memory_space<vmem>>, vector<1x8x1024xf32>,
    } else {
    }
    %cst = arith.constant 0.000000e+00 : f32
    %3 = vector.broadcast %cst : f32 to vector<8x1024xf32>
    %c0_i32_1 = arith.constant 0 : i32
    %c32_i32 = arith.constant 32 : i32
    %4 = arith.addi %c0_i32_1, %c32_i32 : i32
    %c1_i32 = arith.constant 1 : i32
    %5 = scf.for %arg4 = %c0_i32_1 to %4 step %c1_i32 iter_args(%arg5 = %3) -> (vector<8x1024xf32>)  : i32 {
      %c32_i32_8 = arith.constant 32 : i32
      %10 = arith.muli %arg4, %c32_i32_8 : i32
      %c0_i32_9 = arith.constant 0 : i32
      %11 = arith.addi %10, %c0_i32_9 : i32
      %12 = tpu.assume_multiple %11, 8 : i32
      %13 = arith.index_cast %12 : i32 to index
      %c0_10 = arith.constant 0 : index
      %14 = vector.load %arg1[%13, %c0_10] : memref<1024x1024xf32, #tpu.memory_space<vmem>>, vector<8x1024xf32>
      %15 = arith.index_cast %12 : i32 to index
      %c0_11 = arith.constant 0 : index
      %16 = vector.load %arg2[%15, %c0_11] : memref<1024x1024xf32, #tpu.memory_space<vmem>>, vector<8x1024xf32>
      %17 = arith.subf %14, %16 : vector<8x1024xf32>
      %18 = arith.mulf %17, %17 : vector<8x1024xf32>
      %19 = arith.addf %arg5, %18 : vector<8x1024xf32>
      %c8_i32 = arith.constant 8 : i32
      %20 = arith.addi %10, %c8_i32 : i32
      %21 = tpu.assume_multiple %20, 8 : i32
      %22 = arith.index_cast %21 : i32 to index
      %c0_12 = arith.constant 0 : index
      %23 = vector.load %arg1[%22, %c0_12] : memref<1024x1024xf32, #tpu.memory_space<vmem>>, vector<8x1024xf32>
      %24 = arith.index_cast %21 : i32 to index
      %c0_13 = arith.constant 0 : index
      %25 = vector.load %arg2[%24, %c0_13] : memref<1024x1024xf32, #tpu.memory_space<vmem>>, vector<8x1024xf32>
      %26 = arith.subf %23, %25 : vector<8x1024xf32>
      %27 = arith.mulf %26, %26 : vector<8x1024xf32>
      %28 = arith.addf %19, %27 : vector<8x1024xf32>
      %c16_i32 = arith.constant 16 : i32
      %29 = arith.addi %10, %c16_i32 : i32
      %30 = tpu.assume_multiple %29, 8 : i32
      %31 = arith.index_cast %30 : i32 to index
      %c0_14 = arith.constant 0 : index
      %32 = vector.load %arg1[%31, %c0_14] : memref<1024x1024xf32, #tpu.memory_space<vmem>>, vector<8x1024xf32>
      %33 = arith.index_cast %30 : i32 to index
      %c0_15 = arith.constant 0 : index
      %34 = vector.load %arg2[%33, %c0_15] : memref<1024x1024xf32, #tpu.memory_space<vmem>>, vector<8x1024xf32>
      %35 = arith.subf %32, %34 : vector<8x1024xf32>
      %36 = arith.mulf %35, %35 : vector<8x1024xf32>
      %37 = arith.addf %28, %36 : vector<8x1024xf32>
      %c24_i32 = arith.constant 24 : i32
      %38 = arith.addi %10, %c24_i32 : i32
      %39 = tpu.assume_multiple %38, 8 : i32
      %40 = arith.index_cast %39 : i32 to index
      %c0_16 = arith.constant 0 : index
      %41 = vector.load %arg1[%40, %c0_16] : memref<1024x1024xf32, #tpu.memory_space<vmem>>, vector<8x1024xf32>
      %42 = arith.index_cast %39 : i32 to index
      %c0_17 = arith.constant 0 : index
      %43 = vector.load %arg2[%42, %c0_17] : memref<1024x1024xf32, #tpu.memory_space<vmem>>, vector<8x1024xf32>
      %44 = arith.subf %41, %43 : vector<8x1024xf32>
      %45 = arith.mulf %44, %44 : vector<8x1024xf32>
      %46 = arith.addf %37, %45 : vector<8x1024xf32>
      scf.yield %46 : vector<8x1024xf32>
    }
    %c32_i32_2 = arith.constant 32 : i32
    %c0 = arith.constant 0 : index
    %c0_3 = arith.constant 0 : index
    %c0_4 = arith.constant 0 : index
    %6 = vector.load %arg3[%c0, %c0_3, %c0_4] : memref<1x8x1024xf32, #tpu.memory_space<vmem>>, vector<1x8x1024xf32>
    %7 = vector.shape_cast %5 : vector<8x1024xf32> to vector<1x8x1024xf32>
    %8 = arith.addf %6, %7 : vector<1x8x1024xf32>
    %c0_5 = arith.constant 0 : index
    %c0_6 = arith.constant 0 : index
    %c0_7 = arith.constant 0 : index
    %9 = vector.load %arg3[%c0_5, %c0_6, %c0_7] : memref<1x8x1024xf32, #tpu.memory_space<vmem>>, vector<1x8x1024xf32>
    tpu.vector_store %arg3[%c0_5, %c0_6, %c0_7], %8 {strides = array<i32>} : memref<1x8x1024xf32, #tpu.memory_space<vmem>>, vector<1x8x1024xf32>,
    return
  }
  func.func @transform_0(%arg0: i32) -> (i32, i32) {
    %c0_i32 = arith.constant 0 : i32
    %c0_i32_0 = arith.constant 0 : i32
    return %arg0, %c0_i32 : i32, i32
  }
  func.func @transform_1(%arg0: i32) -> (i32, i32) {
    %c0_i32 = arith.constant 0 : i32
    %c0_i32_0 = arith.constant 0 : i32
    return %arg0, %c0_i32 : i32, i32
  }
  func.func @transform_2(%arg0: i32) -> (i32, i32, i32) {
    %c0_i32 = arith.constant 0 : i32
    %c0_i32_0 = arith.constant 0 : i32
    %c0_i32_1 = arith.constant 0 : i32
    %c0_i32_2 = arith.constant 0 : i32
    return %c0_i32, %c0_i32_0, %c0_i32_1 : i32, i32, i32
  }
}

</mosaic_0001>

<bundles_post_ra>
// kernel: tpu_custom_call.1
= control target key start
LH: loop header
LB: loop body
LE: loop exit
PB: predicated region body
PF: predicated region fallthrough
CT: control target
= control target key end

     0   :  { %7 = vsyncpa [#allocation3], 0  ;;  %s731_s0 = inlined_call_operand.hbm [shape: f32[1024,1024], index: 0, kind: input, shape index: {}]   ;;  %s732_s1 = inlined_call_operand.hbm [shape: f32[1024,1024], index: 1, kind: input, shape index: {}]   ;;  %s733_s2 = inlined_call_operand.hbm [shape: f32[1,8,1024], index: 2, kind: output, shape index: {}]  }
   0x1   :  { %8 = vsyncpa [#allocation6], 0 }
   0x2   :  { %9 = vsyncpa [#allocation4], 0  ;;  %s586_s9 = smov [#allocation2]   ;;  %s442_s13 = scalar_lea.hbm %s731_s0, 131072 }
   0x3   :  { %s15_s10 = sshll.u32 %s586_s9, 4  ;;  %p443_p0 = scmp.ne.s32.totalorder %s731_s0, %s442_s13  ;;  %s16_s10 = int_to_ptr.vmem [resolvable:$true] %s15_s10 }
   0x4   :  { %p446_p1 = scmp.lt.u32.totalorder %s442_s13, %s731_s0 }
   0x6   :  { %p448_p2 = pnand %p446_p1, %p443_p0 }
   0x8   :  { %451 = shalt.err (!%p448_p2)
}
   0x9   :  { %s452_s18 = scalar_lea.vmem %s16_s10, 131072  ;;  %p457_p4 = scmp.lt.s32.totalorder %s16_s10, %s16_s10 }
   0xa   :  { %p453_p3 = scmp.ne.s32.totalorder %s16_s10, %s452_s18  ;;  %p458_p5 = scmp.lt.s32.totalorder %s452_s18, %s452_s18 }
   0xc   :  { %p459_p6 = por %p458_p5, %p457_p4 }
   0xe   :  { %p460_p7 = pnand %p459_p6, %p453_p3 }
  0x10   :  { %463 = shalt.err (!%p460_p7)
}
  0x11   :  { %s587_s19 = smov 1024   ;;  %s588_s20 = smov 64  }
  0x12   :  { %21 = dma.hbm_to_vmem [thread:$0]  %s731_s0, 131072, %s16_s10, [#allocation3], %s587_s19, %s587_s19, %s588_s20  }
  0x13   :  { %s589_s23 = smov [#allocation5]   ;;  %s464_s27 = scalar_lea.hbm %s732_s1, 131072 }
  0x14   :  { %s27_s24 = sshll.u32 %s589_s23, 4  ;;  %p465_p8 = scmp.ne.s32.totalorder %s732_s1, %s464_s27  ;;  %s28_s24 = int_to_ptr.vmem [resolvable:$true] %s27_s24 }
  0x15   :  { %p468_p9 = scmp.lt.u32.totalorder %s464_s27, %s732_s1 }
  0x17   :  { %p470_p10 = pnand %p468_p9, %p465_p8 }
  0x19   :  { %473 = shalt.err (!%p470_p10)
}
  0x1a   :  { %s474_s4 = scalar_lea.vmem %s28_s24, 131072  ;;  %p479_p12 = scmp.lt.s32.totalorder %s28_s24, %s28_s24 }
  0x1b   :  { %p475_p11 = scmp.ne.s32.totalorder %s28_s24, %s474_s4  ;;  %p480_p13 = scmp.lt.s32.totalorder %s474_s4, %s474_s4 }
  0x1d   :  { %p481_p0 = por %p480_p13, %p479_p12 }
  0x1f   :  { %p482_p1 = pnand %p481_p0, %p475_p11 }
  0x21   :  { %485 = shalt.err (!%p482_p1)
}
  0x22   :  { %33 = dma.hbm_to_vmem [thread:$0]  %s732_s1, 131072, %s28_s24, [#allocation6], %s587_s19, %s587_s19, %s588_s20  }
  0x23   :  { %544 = dma.done.wait [#allocation3], 131072  }
  0x24   :  { %545 = vsyncadd [#allocation3], 4294836224 }
  0x25   :  { %546 = dma.done.wait [#allocation6], 131072  }
  0x26   :  { %547 = vsyncadd [#allocation6], 4294836224  ;;  %v590_v0 = vmov 0.0   ;;  %v631_v1 = vmov 0.0   ;;  %v633_v2 = vmov 0.0   ;;  %v635_v3 = vmov 0.0  }
  0x27   :  { %44 = vst [vmem:[#allocation7] sm:$0xff] %v590_v0  ;;  %45 = vst [vmem:[#allocation7 + $0x8] sm:$0xff] %v590_v0  ;;  %v637_v4 = vmov 0.0   ;;  %v639_v5 = vmov 0.0   ;;  %v641_v6 = vmov 0.0   ;;  %v643_v7 = vmov 0.0  }
  0x28   :  { %46 = vst [vmem:[#allocation7 + $0x10] sm:$0xff] %v590_v0  ;;  %47 = vst [vmem:[#allocation7 + $0x18] sm:$0xff] %v590_v0  ;;  %v645_v8 = vmov 0.0   ;;  %s647_s1 = smov 0  }
  0x29   :  { %48 = vst [vmem:[#allocation7 + $0x20] sm:$0xff] %v590_v0  ;;  %49 = vst [vmem:[#allocation7 + $0x28] sm:$0xff] %v590_v0 }
  0x2a   :  { %50 = vst [vmem:[#allocation7 + $0x30] sm:$0xff] %v590_v0  ;;  %51 = vst [vmem:[#allocation7 + $0x38] sm:$0xff] %v590_v0 }
  0x2b LB: > { %s669_s6 = sshll.u32 %s584_s1, 5  ;;  %s57_s1 = sadd.s32 1, %s584_s1   ;;  %s584_s1 = sphi %s647_s1, %s57_s1   ;;  %v580_v8 = vphi %v645_v8, %v741_v8   ;;  %v576_v7 = vphi %v643_v7, %v740_v7   ;;  %v572_v6 = vphi %v641_v6, %v739_v6   ;;  %v568_v5 = vphi %v639_v5, %v738_v5   ;;  %v564_v4 = vphi %v637_v4, %v737_v4   ;;  %v560_v3 = vphi %v635_v3, %v736_v3   ;;  %v556_v2 = vphi %v633_v2, %v735_v2   ;;  %v552_v1 = vphi %v631_v1, %v734_v1  }
  0x2c   : > { %s67_s7 = sshra.s32 %s669_s6, 3  ;;  %s114_s8 = sadd.s32 8, %s669_s6 }
  0x2d   : > { %s356_s9 = sshll.u32 %s67_s7, 6  ;;  %s673_s10 = sshra.s32 %s114_s8, 3 }
  0x2e   : > { %s71_s11 = scalar_lea.vmem [#allocation2], %s356_s9  ;;  %s358_s12 = sshll.u32 %s673_s10, 6 }
  0x2f   : > { %v72_v9 = vld [vmem:[%s71_s11] sm:$0xff]  ;;  %v73_v10 = vld [vmem:[%s71_s11 + $0x8] sm:$0xff]  ;;  %v74_v11 = vld [vmem:[%s71_s11 + $0x10] sm:$0xff]  ;;  %s162_s13 = sadd.s32 16, %s669_s6  ;;  %s81_s14 = scalar_lea.vmem [#allocation5], %s356_s9 }
  0x30   : > { %v75_v12 = vld [vmem:[%s71_s11 + $0x18] sm:$0xff]  ;;  %v76_v13 = vld [vmem:[%s71_s11 + $0x20] sm:$0xff]  ;;  %v77_v14 = vld [vmem:[%s71_s11 + $0x28] sm:$0xff]  ;;  %s677_s15 = sshra.s32 %s162_s13, 3  ;;  %s119_s16 = scalar_lea.vmem [#allocation2], %s358_s12 }
  0x31   : > { %v78_v15 = vld [vmem:[%s71_s11 + $0x30] sm:$0xff]  ;;  %v79_v16 = vld [vmem:[%s71_s11 + $0x38] sm:$0xff]  ;;  %v82_v17 = vld [vmem:[%s81_s14] sm:$0xff]  ;;  %s360_s17 = sshll.u32 %s677_s15, 6  ;;  %s210_s18 = sadd.s32 24, %s669_s6 }
  0x32   : > { %v83_v18 = vld [vmem:[%s81_s14 + $0x8] sm:$0xff]  ;;  %v84_v19 = vld [vmem:[%s81_s14 + $0x10] sm:$0xff]  ;;  %v85_v20 = vld [vmem:[%s81_s14 + $0x18] sm:$0xff]  ;;  %v90_v21 = vsub.f32 %v72_v9, %v82_v17  ;;  %s129_s19 = scalar_lea.vmem [#allocation5], %s358_s12  ;;  %s685_s20 = sshra.s32 %s210_s18, 3 }
  0x33   : > { %v86_v22 = vld [vmem:[%s81_s14 + $0x20] sm:$0xff]  ;;  %v87_v23 = vld [vmem:[%s81_s14 + $0x28] sm:$0xff]  ;;  %v88_v24 = vld [vmem:[%s81_s14 + $0x30] sm:$0xff]  ;;  %v91_v25 = vsub.f32 %v73_v10, %v83_v18  ;;  %v92_v26 = vsub.f32 %v74_v11, %v84_v19  ;;  %v93_v27 = vsub.f32 %v75_v12, %v85_v20  ;;  %s167_s21 = scalar_lea.vmem [#allocation2], %s360_s17  ;;  %s362_s22 = sshll.u32 %s685_s20, 6 }
  0x34   : > { %v89_v28 = vld [vmem:[%s81_s14 + $0x38] sm:$0xff]  ;;  %v94_v29 = vsub.f32 %v76_v13, %v86_v22  ;;  %v95_v30 = vsub.f32 %v77_v14, %v87_v23  ;;  %v96_v31 = vsub.f32 %v78_v15, %v88_v24  ;;  %v98_v32 = vmul.f32 %v90_v21, %v90_v21  ;;  %v120_v33 = vld [vmem:[%s119_s16] sm:$0xff]  ;;  %v121_v34 = vld [vmem:[%s119_s16 + $0x8] sm:$0xff]  ;;  %s177_s23 = scalar_lea.vmem [#allocation5], %s360_s17  ;;  %s215_s24 = scalar_lea.vmem [#allocation2], %s362_s22 }
  0x35   : > { %v97_v35 = vsub.f32 %v79_v16, %v89_v28  ;;  %v99_v36 = vmul.f32 %v91_v25, %v91_v25  ;;  %v100_v37 = vmul.f32 %v92_v26, %v92_v26  ;;  %v101_v38 = vmul.f32 %v93_v27, %v93_v27  ;;  %v122_v39 = vld [vmem:[%s119_s16 + $0x10] sm:$0xff]  ;;  %v123_v40 = vld [vmem:[%s119_s16 + $0x18] sm:$0xff]  ;;  %v124_v41 = vld [vmem:[%s119_s16 + $0x20] sm:$0xff]  ;;  %s225_s25 = scalar_lea.vmem [#allocation5], %s362_s22  ;;  %p54_p2 = scmp.ge.s32.totalorder %s57_s1, 32  }
  0x36   : > { %v102_v42 = vmul.f32 %v94_v29, %v94_v29  ;;  %v103_v43 = vmul.f32 %v95_v30, %v95_v30  ;;  %v104_v44 = vmul.f32 %v96_v31, %v96_v31  ;;  %v106_v45 = vadd.f32 %v580_v8, %v98_v32  ;;  %v125_v46 = vld [vmem:[%s119_s16 + $0x28] sm:$0xff]  ;;  %v126_v47 = vld [vmem:[%s119_s16 + $0x30] sm:$0xff]  ;;  %v127_v48 = vld [vmem:[%s119_s16 + $0x38] sm:$0xff]  ;;  %s591_s26 = smov (%p54_p2), [#allocation7]  }
  0x37   : > { %v105_v49 = vmul.f32 %v97_v35, %v97_v35  ;;  %v107_v50 = vadd.f32 %v576_v7, %v99_v36  ;;  %v108_v51 = vadd.f32 %v572_v6, %v100_v37  ;;  %v109_v52 = vadd.f32 %v568_v5, %v101_v38  ;;  %v130_v53 = vld [vmem:[%s129_s19] sm:$0xff]  ;;  %v131_v54 = vld [vmem:[%s129_s19 + $0x8] sm:$0xff]  ;;  %v132_v55 = vld [vmem:[%s129_s19 + $0x10] sm:$0xff]  ;;  %s288_s27 = sshll.u32 (%p54_p2), %s591_s26, 4  ;;  %s289_s27 = int_to_ptr.vmem [resolvable:$true] %s288_s27 }
  0x38   : > { %v110_v56 = vadd.f32 %v564_v4, %v102_v42  ;;  %v111_v57 = vadd.f32 %v560_v3, %v103_v43  ;;  %v112_v58 = vadd.f32 %v556_v2, %v104_v44  ;;  %v133_v59 = vld [vmem:[%s129_s19 + $0x18] sm:$0xff]  ;;  %v134_v60 = vld [vmem:[%s129_s19 + $0x20] sm:$0xff]  ;;  %v135_v61 = vld [vmem:[%s129_s19 + $0x28] sm:$0xff]  ;;  %v138_v62 = vsub.f32 %v120_v33, %v130_v53  ;;  %s486_s28 = scalar_lea.vmem (%p54_p2), %s289_s27, 1024  ;;  %p491_p4 = scmp.lt.s32.totalorder (%p54_p2), %s289_s27, %s289_s27 }
  0x39   : > { %v113_v63 = vadd.f32 %v552_v1, %v105_v49  ;;  %v136_v0 = vld [vmem:[%s129_s19 + $0x30] sm:$0xff]  ;;  %v137_v5 = vld [vmem:[%s129_s19 + $0x38] sm:$0xff]  ;;  %v139_v6 = vsub.f32 %v121_v34, %v131_v54  ;;  %v140_v7 = vsub.f32 %v122_v39, %v132_v55  ;;  %v141_v8 = vsub.f32 %v123_v40, %v133_v59  ;;  %v168_v3 = vld [vmem:[%s167_s21] sm:$0xff]  ;;  %p487_p3 = scmp.ne.s32.totalorder (%p54_p2), %s289_s27, %s486_s28  ;;  %p492_p5 = scmp.lt.s32.totalorder (%p54_p2), %s486_s28, %s486_s28 }
  0x3a   : > { %v142_v9 = vsub.f32 %v124_v41, %v134_v60  ;;  %v143_v10 = vsub.f32 %v125_v46, %v135_v61  ;;  %v144_v4 = vsub.f32 %v126_v47, %v136_v0  ;;  %v145_v11 = vsub.f32 %v127_v48, %v137_v5  ;;  %v169_v2 = vld [vmem:[%s167_s21 + $0x8] sm:$0xff]  ;;  %v170_v12 = vld [vmem:[%s167_s21 + $0x10] sm:$0xff]  ;;  %v171_v13 = vld [vmem:[%s167_s21 + $0x18] sm:$0xff] }
  0x3b   : > { %v146_v14 = vmul.f32 %v138_v62, %v138_v62  ;;  %v147_v15 = vmul.f32 %v139_v6, %v139_v6  ;;  %v148_v1 = vmul.f32 %v140_v7, %v140_v7  ;;  %v149_v16 = vmul.f32 %v141_v8, %v141_v8  ;;  %v172_v17 = vld [vmem:[%s167_s21 + $0x20] sm:$0xff]  ;;  %v173_v18 = vld [vmem:[%s167_s21 + $0x28] sm:$0xff]  ;;  %v174_v19 = vld [vmem:[%s167_s21 + $0x30] sm:$0xff]  ;;  %p493_p6 = por (%p54_p2), %p492_p5, %p491_p4 }
  0x3c   : > { %v150_v20 = vmul.f32 %v142_v9, %v142_v9  ;;  %v151_v21 = vmul.f32 %v143_v10, %v143_v10  ;;  %v152_v22 = vmul.f32 %v144_v4, %v144_v4  ;;  %v153_v23 = vmul.f32 %v145_v11, %v145_v11  ;;  %v175_v24 = vld [vmem:[%s167_s21 + $0x38] sm:$0xff]  ;;  %v178_v25 = vld [vmem:[%s177_s23] sm:$0xff]  ;;  %v179_v26 = vld [vmem:[%s177_s23 + $0x8] sm:$0xff] }
  0x3d   : > { %v154_v27 = vadd.f32 %v146_v14, %v106_v45  ;;  %v155_v28 = vadd.f32 %v147_v15, %v107_v50  ;;  %v156_v29 = vadd.f32 %v148_v1, %v108_v51  ;;  %v157_v30 = vadd.f32 %v149_v16, %v109_v52  ;;  %v180_v31 = vld [vmem:[%s177_s23 + $0x10] sm:$0xff]  ;;  %v181_v32 = vld [vmem:[%s177_s23 + $0x18] sm:$0xff]  ;;  %v182_v33 = vld [vmem:[%s177_s23 + $0x20] sm:$0xff]  ;;  %p494_p7 = pnand (%p54_p2), %p493_p6, %p487_p3 }
  0x3e   : > { %v158_v34 = vadd.f32 %v150_v20, %v110_v56  ;;  %v159_v35 = vadd.f32 %v151_v21, %v111_v57  ;;  %v160_v36 = vadd.f32 %v152_v22, %v112_v58  ;;  %v161_v37 = vadd.f32 %v153_v23, %v113_v63  ;;  %v183_v38 = vld [vmem:[%s177_s23 + $0x28] sm:$0xff]  ;;  %v184_v39 = vld [vmem:[%s177_s23 + $0x30] sm:$0xff]  ;;  %v185_v40 = vld [vmem:[%s177_s23 + $0x38] sm:$0xff] }
  0x3f   : > { %v186_v41 = vsub.f32 %v168_v3, %v178_v25  ;;  %v187_v42 = vsub.f32 %v169_v2, %v179_v26  ;;  %v188_v43 = vsub.f32 %v170_v12, %v180_v31  ;;  %v189_v44 = vsub.f32 %v171_v13, %v181_v32  ;;  %v216_v49 = vld [vmem:[%s215_s24] sm:$0xff]  ;;  %v217_v50 = vld [vmem:[%s215_s24 + $0x8] sm:$0xff]  ;;  %v218_v51 = vld [vmem:[%s215_s24 + $0x10] sm:$0xff] }
  0x40   : > { %v190_v46 = vsub.f32 %v172_v17, %v182_v33  ;;  %v191_v45 = vsub.f32 %v173_v18, %v183_v38  ;;  %v192_v47 = vsub.f32 %v174_v19, %v184_v39  ;;  %v193_v48 = vsub.f32 %v175_v24, %v185_v40  ;;  %v219_v52 = vld [vmem:[%s215_s24 + $0x18] sm:$0xff]  ;;  %v220_v57 = vld [vmem:[%s215_s24 + $0x20] sm:$0xff]  ;;  %v221_v58 = vld [vmem:[%s215_s24 + $0x28] sm:$0xff] }
  0x41   : > { %v194_v53 = vmul.f32 %v186_v41, %v186_v41  ;;  %v195_v54 = vmul.f32 %v187_v42, %v187_v42  ;;  %v196_v55 = vmul.f32 %v188_v43, %v188_v43  ;;  %v197_v56 = vmul.f32 %v189_v44, %v189_v44  ;;  %v222_v59 = vld [vmem:[%s215_s24 + $0x30] sm:$0xff]  ;;  %v223_v60 = vld [vmem:[%s215_s24 + $0x38] sm:$0xff]  ;;  %v226_v61 = vld [vmem:[%s225_s25] sm:$0xff] }
  0x42   : > { %v198_v62 = vmul.f32 %v190_v46, %v190_v46  ;;  %v199_v63 = vmul.f32 %v191_v45, %v191_v45  ;;  %v200_v0 = vmul.f32 %v192_v47, %v192_v47  ;;  %v201_v5 = vmul.f32 %v193_v48, %v193_v48  ;;  %v227_v6 = vld [vmem:[%s225_s25 + $0x8] sm:$0xff]  ;;  %v228_v7 = vld [vmem:[%s225_s25 + $0x10] sm:$0xff]  ;;  %v229_v8 = vld [vmem:[%s225_s25 + $0x18] sm:$0xff] }
  0x43   : > { %v202_v9 = vadd.f32 %v194_v53, %v154_v27  ;;  %v203_v10 = vadd.f32 %v195_v54, %v155_v28  ;;  %v204_v4 = vadd.f32 %v196_v55, %v156_v29  ;;  %v205_v11 = vadd.f32 %v197_v56, %v157_v30  ;;  %v230_v3 = vld [vmem:[%s225_s25 + $0x20] sm:$0xff]  ;;  %v231_v2 = vld [vmem:[%s225_s25 + $0x28] sm:$0xff]  ;;  %v232_v12 = vld [vmem:[%s225_s25 + $0x30] sm:$0xff] }
  0x44   : > { %v206_v13 = vadd.f32 %v198_v62, %v158_v34  ;;  %v207_v14 = vadd.f32 %v199_v63, %v159_v35  ;;  %v208_v15 = vadd.f32 %v200_v0, %v160_v36  ;;  %v209_v1 = vadd.f32 %v201_v5, %v161_v37  ;;  %v233_v16 = vld [vmem:[%s225_s25 + $0x38] sm:$0xff]  ;;  %v258_v41 = vld [vmem:[#allocation7] sm:$0xff] (%p54_p2)  ;;  %v259_v42 = vld [vmem:[#allocation7 + $0x8] sm:$0xff] (%p54_p2) }
  0x45   : > { %v234_v17 = vsub.f32 %v216_v49, %v226_v61  ;;  %v235_v18 = vsub.f32 %v217_v50, %v227_v6  ;;  %v236_v19 = vsub.f32 %v218_v51, %v228_v7  ;;  %v237_v20 = vsub.f32 %v219_v52, %v229_v8  ;;  %v260_v43 = vld [vmem:[#allocation7 + $0x10] sm:$0xff] (%p54_p2)  ;;  %v261_v47 = vld [vmem:[#allocation7 + $0x18] sm:$0xff] (%p54_p2)  ;;  %v262_v48 = vld [vmem:[#allocation7 + $0x20] sm:$0xff] (%p54_p2) }
  0x46   : > { %v238_v21 = vsub.f32 %v220_v57, %v230_v3  ;;  %v239_v22 = vsub.f32 %v221_v58, %v231_v2  ;;  %v240_v23 = vsub.f32 %v222_v59, %v232_v12  ;;  %v241_v24 = vsub.f32 %v223_v60, %v233_v16  ;;  %56 = sbr.rel (!%p54_p2) target bundleno = 43 (0x2b), region = 55  ;;  %v263_v49 = vld [vmem:[#allocation7 + $0x28] sm:$0xff] (%p54_p2)  ;;  %v264_v53 = vld [vmem:[#allocation7 + $0x30] sm:$0xff] (%p54_p2)  ;;  %v265_v54 = vld [vmem:[#allocation7 + $0x38] sm:$0xff] (%p54_p2) }
  0x47   : > { %v242_v25 = vmul.f32 %v234_v17, %v234_v17  ;;  %v243_v26 = vmul.f32 %v235_v18, %v235_v18  ;;  %v244_v27 = vmul.f32 %v236_v19, %v236_v19  ;;  %v245_v28 = vmul.f32 %v237_v20, %v237_v20 }
  0x48   : > { %v246_v29 = vmul.f32 %v238_v21, %v238_v21  ;;  %v247_v30 = vmul.f32 %v239_v22, %v239_v22  ;;  %v248_v31 = vmul.f32 %v240_v23, %v240_v23  ;;  %v249_v32 = vmul.f32 %v241_v24, %v241_v24 }
  0x49   : > { %v250_v33 = vadd.f32 %v242_v25, %v202_v9   ;;  %v251_v34 = vadd.f32 %v243_v26, %v203_v10   ;;  %v252_v35 = vadd.f32 %v244_v27, %v204_v4   ;;  %v253_v36 = vadd.f32 %v245_v28, %v205_v11  }
  0x4a   : > { %v254_v37 = vadd.f32 %v246_v29, %v206_v13   ;;  %v255_v38 = vadd.f32 %v247_v30, %v207_v14   ;;  %v256_v39 = vadd.f32 %v248_v31, %v208_v15   ;;  %v257_v40 = vadd.f32 %v249_v32, %v209_v1  }
  0x4b   : > { %v738_v5 = vmov %v253_v36  ;;  %v739_v6 = vmov %v252_v35  ;;  %v740_v7 = vmov %v251_v34  ;;  %v741_v8 = vmov %v250_v33 }
  0x4c   : > { %v734_v1 = vmov %v257_v40  ;;  %v735_v2 = vmov %v256_v39  ;;  %v736_v3 = vmov %v255_v38  ;;  %v737_v4 = vmov %v254_v37 }
  0x4d   :  { %v266_v44 = vadd.f32 %v258_v41, %v250_v33  ;;  %v267_v46 = vadd.f32 %v259_v42, %v251_v34  ;;  %v268_v45 = vadd.f32 %v260_v43, %v252_v35  ;;  %v269_v50 = vadd.f32 %v261_v47, %v253_v36 }
  0x4e   :  { %v270_v51 = vadd.f32 %v262_v48, %v254_v37  ;;  %v271_v52 = vadd.f32 %v263_v49, %v255_v38  ;;  %v272_v55 = vadd.f32 %v264_v53, %v256_v39  ;;  %v273_v56 = vadd.f32 %v265_v54, %v257_v40 }
  0x4f   :  { %274 = vst [vmem:[#allocation7] sm:$0xff] %v266_v44  ;;  %275 = vst [vmem:[#allocation7 + $0x8] sm:$0xff] %v267_v46 }
  0x50   :  { %276 = vst [vmem:[#allocation7 + $0x10] sm:$0xff] %v268_v45  ;;  %277 = vst [vmem:[#allocation7 + $0x18] sm:$0xff] %v269_v50 }
  0x51   :  { %278 = vst [vmem:[#allocation7 + $0x20] sm:$0xff] %v270_v51  ;;  %279 = vst [vmem:[#allocation7 + $0x28] sm:$0xff] %v271_v52 }
  0x52   :  { %280 = vst [vmem:[#allocation7 + $0x30] sm:$0xff] %v272_v55  ;;  %281 = vst [vmem:[#allocation7 + $0x38] sm:$0xff] %v273_v56 }
  0x53   :  { %497 = shalt.err (!%p494_p7)
}
  0x54   :  { %s498_s3 = scalar_lea.hbm %s733_s2, 1024 }
  0x55   :  { %p499_p8 = scmp.ne.s32.totalorder %s733_s2, %s498_s3  ;;  %p502_p9 = scmp.lt.u32.totalorder %s498_s3, %s733_s2 }
  0x57   :  { %p504_p10 = pnand %p502_p9, %p499_p8 }
  0x59   :  { %507 = shalt.err (!%p504_p10)
}
  0x5a   :  { %291 = dma.vmem_to_hbm [thread:$0]  %s289_s27, 1024, %s733_s2, [#allocation4]  }
  0x5b   :  { %548 = dma.done.wait [#allocation4], 1024  }
  0x5c   :  { %549 = vsyncadd [#allocation4], 4294966272 }
  0x5d   :  { %295 = vsyncpa [#allocation3], 1 }
  0x5e   :  { %296 = vsyncpa [#allocation6], 1 }
  0x5f   :  { %297 = vsyncpa [#allocation4], 1 }

</bundles_post_ra>
